<compile_context>
chip_gen: v5e
topology: v5e:2x2
jax: 0.10.0
libtpu: 0.0.40
codegen_flags: <defaults>
</compile_context>

<pallas_src>
import functools

import jax
import jax.numpy as jnp
from jax.experimental import pallas as pl
from jax.experimental.pallas import tpu as pltpu


def _se_kernel(x_ref, w1_ref, b1_ref, w2_ref, b2_ref, o_ref, *, inv_hw):
    # x_ref block: (Bt, C, HWp), input dtype (f32 or bf16).
    xb = x_ref[...]

    # --- squeeze: global average pool over spatial (lane) axis, f32 accum ---
    s = jnp.sum(xb.astype(jnp.float32), axis=-1) * inv_hw            # (Bt, C)

    # --- excitation: FC1 -> ReLU -> FC2 -> Sigmoid (f32 math) ---------------
    h = jnp.dot(s, w1_ref[...], preferred_element_type=jnp.float32) + b1_ref[...]
    h = jnp.maximum(h, 0.0)                                          # (Bt, hidden)
    g = jnp.dot(h, w2_ref[...], preferred_element_type=jnp.float32) + b2_ref[...]
    g = jax.nn.sigmoid(g)                                            # (Bt, C)

    # --- scale: per-channel gate broadcast over spatial lanes ---------------
    o_ref[...] = xb * g.astype(xb.dtype)[:, :, None]


def squeeze_and_excitation(x_nchw, w1, b1, w2, b2):
    """x_nchw: (N, C, H, W), any float dtype (kept as-is for I/O).
    w1: (hidden, C), b1: (hidden,), w2: (C, hidden), b2: (C,) -- PyTorch Linear layout.
    """
    N, C, H, W = x_nchw.shape
    HW = H * W
    hidden = w1.shape[0]
    dtype = x_nchw.dtype
    itemsize = jnp.dtype(dtype).itemsize

    # Lane-dense spatial axis: pad H*W up to a multiple of 128 with zeros.
    # Zeros don't affect the sum (we divide by the true HW) and padded lanes
    # are sliced off after the call.
    HW_pad = ((HW + 127) // 128) * 128
    x_flat = x_nchw.reshape(N, C, HW)
    if HW_pad != HW:
        x_flat = jnp.pad(x_flat, ((0, 0), (0, 0), (0, HW_pad - HW)))

    # Pick the batch tile Bt: largest divisor of N such that the double-buffered
    # in+out blocks (4 * block_bytes) fit a ~24 MiB budget (v7x-safe), and such
    # that the grid has length >= 2 when N >= 2 (keeps both v7x TCs busy).
    budget = 24 * 1024 * 1024

    def block_bytes(bt):
        return bt * C * HW_pad * itemsize

    bt = 1
    for cand in range(N, 0, -1):
        if N % cand != 0:
            continue
        if N >= 2 and cand > N // 2:
            continue
        if 4 * block_bytes(cand) <= budget:
            bt = cand
            break
    # TODO(synk): if even a single (1, C, HWp) slab blows the v7x VMEM budget,
    # a two-pass (partial-sum gates, then tiled scale) variant would be needed.

    # Tiny weights: pre-transpose once in the wrapper so the kernel does plain
    # row-major (Bt,C)x(C,hidden) and (Bt,hidden)x(hidden,C) matmuls with no
    # in-kernel transposes.
    f32 = jnp.float32
    w1_t = jnp.asarray(w1, f32).T                    # (C, hidden)
    w2_t = jnp.asarray(w2, f32).T                    # (hidden, C)
    b1_r = jnp.asarray(b1, f32).reshape(1, hidden)
    b2_r = jnp.asarray(b2, f32).reshape(1, C)

    weight_bytes = (C * hidden * 2 + hidden + C) * 4
    vmem_limit = int(max(4 * block_bytes(bt) + weight_bytes + (4 << 20), 32 << 20))

    kernel = functools.partial(_se_kernel, inv_hw=float(1.0 / HW))

    out_flat = pl.pallas_call(
        kernel,
        out_shape=jax.ShapeDtypeStruct((N, C, HW_pad), dtype),
        grid_spec=pltpu.PrefetchScalarGridSpec(
            num_scalar_prefetch=0,
            grid=(N // bt,),
            in_specs=[
                pl.BlockSpec((bt, C, HW_pad), lambda n: (n, 0, 0)),
                pl.BlockSpec((C, hidden), lambda n: (0, 0)),
                pl.BlockSpec((1, hidden), lambda n: (0, 0)),
                pl.BlockSpec((hidden, C), lambda n: (0, 0)),
                pl.BlockSpec((1, C), lambda n: (0, 0)),
            ],
            out_specs=pl.BlockSpec((bt, C, HW_pad), lambda n: (n, 0, 0)),
        ),
        compiler_params=pltpu.CompilerParams(
            dimension_semantics=("parallel",),
            vmem_limit_bytes=vmem_limit,
        ),
    )(x_flat, w1_t, b1_r, w2_t, b2_r)

    if HW_pad != HW:
        out_flat = out_flat[:, :, :HW]
    return out_flat.reshape(N, C, H, W)


def _reference(x, w1, b1, w2, b2):
    # Pure-JAX reference mirroring the PyTorch forward (f32).
    s = jnp.mean(x, axis=(2, 3))                     # (N, C)
    h = jnp.maximum(s @ w1.T + b1, 0.0)              # (N, hidden)
    g = jax.nn.sigmoid(h @ w2.T + b2)                # (N, C)
    return x * g[:, :, None, None]


if __name__ == "__main__":
    # Small shapes consistent with the module: channels=64, r=16 -> hidden=4.
    N, C, H, W = 2, 64, 16, 16
    r = 16
    hidden = C // r

    key = jax.random.PRNGKey(0)
    kx, kw1, kb1, kw2, kb2 = jax.random.split(key, 5)

    x = jax.random.normal(kx, (N, C, H, W), dtype=jnp.float32)
    # Deterministic synthetic parameters (PyTorch Linear layout: (out, in)).
    w1 = jax.random.normal(kw1, (hidden, C), dtype=jnp.float32) * 0.1
    b1 = jax.random.normal(kb1, (hidden,), dtype=jnp.float32) * 0.1
    w2 = jax.random.normal(kw2, (C, hidden), dtype=jnp.float32) * 0.1
    b2 = jax.random.normal(kb2, (C,), dtype=jnp.float32) * 0.1

    # f32 path
    out = squeeze_and_excitation(x, w1, b1, w2, b2)
    out = jax.block_until_ready(out)
    ref = _reference(x, w1, b1, w2, b2)
    assert out.shape == (N, C, H, W)
    assert jnp.allclose(out, ref, atol=1e-5, rtol=1e-5), "f32 mismatch vs reference"

    # bf16 I/O path (half the HBM bytes; squeeze/FC math still f32 in-kernel).
    x_bf = x.astype(jnp.bfloat16)
    out_bf = squeeze_and_excitation(x_bf, w1, b1, w2, b2)
    out_bf = jax.block_until_ready(out_bf)
    ref_bf = _reference(x_bf.astype(jnp.float32), w1, b1, w2, b2)
    assert out_bf.dtype == jnp.bfloat16
    assert jnp.allclose(out_bf.astype(jnp.float32), ref_bf, atol=5e-2, rtol=5e-2), \
        "bf16 mismatch vs reference"

    print("KERNEL_OK")
</pallas_src>

<mosaic_0001>
module attributes {stable_mosaic.version = 11 : i64} {
  func.func @_se_kernel(%arg0: i32, %arg1: memref<1x64x256xf32, #tpu.memory_space<vmem>>, %arg2: memref<64x4xf32, #tpu.memory_space<vmem>>, %arg3: memref<1x4xf32, #tpu.memory_space<vmem>>, %arg4: memref<4x64xf32, #tpu.memory_space<vmem>>, %arg5: memref<1x64xf32, #tpu.memory_space<vmem>>, %arg6: memref<1x64x256xf32, #tpu.memory_space<vmem>>) attributes {dimension_semantics = [#tpu.dimension_semantics<parallel>], iteration_bounds = array<i64: 2>, scalar_prefetch = 0 : i64, scratch_operands = 0 : i64, tpu.core_type = #tpu.core_type<tc>, window_params = [{transform_indices = @transform_0, window_bounds = array<i64: 1, 64, 256>}, {pipeline_mode = #tpu.pipeline_mode<synchronous>, transform_indices = @transform_1, window_bounds = array<i64: 64, 4>}, {pipeline_mode = #tpu.pipeline_mode<synchronous>, transform_indices = @transform_2, window_bounds = array<i64: 1, 4>}, {pipeline_mode = #tpu.pipeline_mode<synchronous>, transform_indices = @transform_3, window_bounds = array<i64: 4, 64>}, {pipeline_mode = #tpu.pipeline_mode<synchronous>, transform_indices = @transform_4, window_bounds = array<i64: 1, 64>}, {transform_indices = @transform_5, window_bounds = array<i64: 1, 64, 256>}]} {
    %c0 = arith.constant 0 : index
    %c0_0 = arith.constant 0 : index
    %c0_1 = arith.constant 0 : index
    %0 = vector.load %arg1[%c0, %c0_0, %c0_1] : memref<1x64x256xf32, #tpu.memory_space<vmem>>, vector<1x64x256xf32>
    %cst = arith.constant dense<0.000000e+00> : vector<1x64xf32>
    %1 = vector.multi_reduction <add>, %0, %cst [2] : vector<1x64x256xf32> to vector<1x64xf32>
    %cst_2 = arith.constant 3.906250e-03 : f32
    %2 = vector.broadcast %cst_2 : f32 to vector<1x64xf32>
    %3 = arith.mulf %1, %2 : vector<1x64xf32>
    %c0_3 = arith.constant 0 : index
    %c0_4 = arith.constant 0 : index
    %4 = vector.load %arg2[%c0_3, %c0_4] : memref<64x4xf32, #tpu.memory_space<vmem>>, vector<64x4xf32>
    %cst_5 = arith.constant dense<0.000000e+00> : vector<1x4xf32>
    %5 = tpu.matmul %3, %4, %cst_5 {dimension_numbers = #tpu.dot_dimension_numbers<[1], [0], [0], [1], [0, 0, 1, 1], [], []>} : vector<1x64xf32>, vector<64x4xf32>, vector<1x4xf32> -> vector<1x4xf32>
    %c0_6 = arith.constant 0 : index
    %c0_7 = arith.constant 0 : index
    %6 = vector.load %arg3[%c0_6, %c0_7] : memref<1x4xf32, #tpu.memory_space<vmem>>, vector<1x4xf32>
    %7 = arith.addf %5, %6 : vector<1x4xf32>
    %cst_8 = arith.constant 0.000000e+00 : f32
    %8 = vector.broadcast %cst_8 : f32 to vector<1x4xf32>
    %9 = arith.maximumf %7, %8 : vector<1x4xf32>
    %c0_9 = arith.constant 0 : index
    %c0_10 = arith.constant 0 : index
    %10 = vector.load %arg4[%c0_9, %c0_10] : memref<4x64xf32, #tpu.memory_space<vmem>>, vector<4x64xf32>
    %cst_11 = arith.constant dense<0.000000e+00> : vector<1x64xf32>
    %11 = tpu.matmul %9, %10, %cst_11 {dimension_numbers = #tpu.dot_dimension_numbers<[1], [0], [0], [1], [0, 0, 1, 1], [], []>} : vector<1x4xf32>, vector<4x64xf32>, vector<1x64xf32> -> vector<1x64xf32>
    %c0_12 = arith.constant 0 : index
    %c0_13 = arith.constant 0 : index
    %12 = vector.load %arg5[%c0_12, %c0_13] : memref<1x64xf32, #tpu.memory_space<vmem>>, vector<1x64xf32>
    %13 = arith.addf %11, %12 : vector<1x64xf32>
    %14 = arith.negf %13 : vector<1x64xf32>
    %15 = math.exp %14 : vector<1x64xf32>
    %cst_14 = arith.constant 1.000000e+00 : f32
    %16 = vector.broadcast %cst_14 : f32 to vector<1x64xf32>
    %17 = arith.addf %16, %15 : vector<1x64xf32>
    %18 = arith.divf %16, %17 : vector<1x64xf32>
    %19 = vector.shape_cast %18 : vector<1x64xf32> to vector<1x64x1xf32>
    %20 = vector.broadcast %19 : vector<1x64x1xf32> to vector<1x64x256xf32>
    %21 = arith.mulf %0, %20 : vector<1x64x256xf32>
    %c0_15 = arith.constant 0 : index
    %c0_16 = arith.constant 0 : index
    %c0_17 = arith.constant 0 : index
    %22 = vector.load %arg6[%c0_15, %c0_16, %c0_17] : memref<1x64x256xf32, #tpu.memory_space<vmem>>, vector<1x64x256xf32>
    tpu.vector_store %arg6[%c0_15, %c0_16, %c0_17], %21 {strides = array<i32>} : memref<1x64x256xf32, #tpu.memory_space<vmem>>, vector<1x64x256xf32>,
    return
  }
  func.func @transform_0(%arg0: i32) -> (i32, i32, i32) {
    %c0_i32 = arith.constant 0 : i32
    %c0_i32_0 = arith.constant 0 : i32
    %c0_i32_1 = arith.constant 0 : i32
    return %arg0, %c0_i32, %c0_i32_0 : i32, i32, i32
  }
  func.func @transform_1(%arg0: i32) -> (i32, i32) {
    %c0_i32 = arith.constant 0 : i32
    %c0_i32_0 = arith.constant 0 : i32
    %c0_i32_1 = arith.constant 0 : i32
    return %c0_i32, %c0_i32_0 : i32, i32
  }
  func.func @transform_2(%arg0: i32) -> (i32, i32) {
    %c0_i32 = arith.constant 0 : i32
    %c0_i32_0 = arith.constant 0 : i32
    %c0_i32_1 = arith.constant 0 : i32
    return %c0_i32, %c0_i32_0 : i32, i32
  }
  func.func @transform_3(%arg0: i32) -> (i32, i32) {
    %c0_i32 = arith.constant 0 : i32
    %c0_i32_0 = arith.constant 0 : i32
    %c0_i32_1 = arith.constant 0 : i32
    return %c0_i32, %c0_i32_0 : i32, i32
  }
  func.func @transform_4(%arg0: i32) -> (i32, i32) {
    %c0_i32 = arith.constant 0 : i32
    %c0_i32_0 = arith.constant 0 : i32
    %c0_i32_1 = arith.constant 0 : i32
    return %c0_i32, %c0_i32_0 : i32, i32
  }
  func.func @transform_5(%arg0: i32) -> (i32, i32, i32) {
    %c0_i32 = arith.constant 0 : i32
    %c0_i32_0 = arith.constant 0 : i32
    %c0_i32_1 = arith.constant 0 : i32
    return %arg0, %c0_i32, %c0_i32_0 : i32, i32, i32
  }
}

</mosaic_0001>

<bundles_post_ra>
// kernel: tpu_custom_call.1
= control target key start
LH: loop header
LB: loop body
LE: loop exit
PB: predicated region body
PF: predicated region fallthrough
CT: control target
= control target key end

     0   :  { %10 = vsyncpa [#allocation3], 0  ;;  %s1046_s0 = inlined_call_operand.hbm [shape: f32[2,64,256], index: 0, kind: input, shape index: {}]   ;;  %s1047_s1 = inlined_call_operand.vmem [shape: f32[64,4], index: 1, kind: input, shape index: {}]   ;;  %s1048_s2 = inlined_call_operand.vmem [shape: f32[1,4], index: 2, kind: input, shape index: {}]   ;;  %s1049_s3 = inlined_call_operand.vmem [shape: f32[4,64], index: 3, kind: input, shape index: {}]   ;;  %s1050_s4 = inlined_call_operand.vmem [shape: f32[1,64], index: 4, kind: input, shape index: {}]   ;;  %s1051_s5 = inlined_call_operand.hbm [shape: f32[2,64,256], index: 5, kind: output, shape index: {}]  }
   0x1   :  { %12 = vsyncpa [#allocation3 + $0x1], 0 }
   0x2   :  { %13 = vsyncpa [#allocation4], 0 }
   0x3   :  { %15 = vsyncpa [#allocation4 + $0x1], 0  ;;  %s799_s18 = smov 0   ;;  %s801_s19 = smov 0  }
   0x4   :  { %s803_s20 = smov 0   ;;  %s805_s21 = smov 0  }
   0x5 LB: > { %s820_s22 = sadd.s32 4294967295, %s763_s21   ;;  %s584_s23 = sadd.s32 4294967294, %s763_s21   ;;  %s763_s21 = sphi %s805_s21, %s1061_s21   ;;  %s759_s20 = sphi %s803_s20, %s1060_s20   ;;  %s755_s19 = sphi %s801_s19, %s1059_s19   ;;  %s751_s18 = sphi %s799_s18, %s1058_s18  }
   0x6   : > { %s824_s24 = sadd.s32 1, %s763_s21   ;;  %s28_s25 = sadd.s32 1, %s759_s20 }
   0x7   : > { %s25_s26 = ssub.s32 %s763_s21, %s824_s24  ;;  %p35_p0 = scmp.ne.s32.totalorder %s759_s20, %s755_s19 }
   0x8   : > { %p26_p1 = scmp.eq.s32.totalorder %s25_s26, 0  ;;  %p36_p2 = scmp.eq.s32.totalorder %s763_s21, 0 }
   0x9   : > { %p41_p3 = scmp.ne.s32.totalorder %s755_s19, %s751_s18  ;;  %p42_p4 = scmp.eq.s32.totalorder %s820_s22, 0 }
   0xa   : > { %s836_s27 = scalar_select %p26_p1, %s759_s20, %s28_s25  }
   0xb   : > { %p838_p5 = por %p36_p2, %p35_p0  ;;  %p842_p6 = por %p42_p4, %p41_p3 }
   0xc   : > { %p149_p7 = scmp.eq.s32.totalorder %s820_s22, 1  ;;  %p155_p8 = scmp.eq.s32.totalorder %s584_s23, 1 }
   0xd   : > { %p616_p10 = scmp.lt.s32.totalorder %s763_s21, 2  ;;  %s187_s7 = sand.u32 1, %s759_s20  }
   0xe   : > { %p849_p11 = por %p149_p7, %p35_p0  ;;  %p853_p12 = por %p155_p8, %p41_p3 }
   0xf   : > { %s602_s8 = sshll.u32 %s763_s21, 7  ;;  %s587_s9 = sshll.u32 %s187_s7, 7 }
  0x10   : > { %s196_s12 = scalar_lea.hbm %s1046_s0, %s602_s8  ;;  %s191_s14 = scalar_lea.vmem [#allocation2], %s587_s9 }
  0x11   : > { %s197_s13 = sshll.u32 %s196_s12, 4  ;;  %s199_s15 = sshll.u32 %s191_s14, 4  ;;  %s198_s13 = int_to_ptr.hbm [resolvable:$true] %s197_s13  ;;  %s200_s15 = int_to_ptr.vmem [resolvable:$true] %s199_s15 }
  0x12   : > { %p864_p13 = pnand %p616_p10, %p838_p5  ;;  %p590_p0 = scmp.ge.s32.totalorder %s763_s21, 1 }
  0x13   : > { %p207_p1 = scmp.lt.s32.totalorder %s763_s21, 3  ;;  %s188_s17 = scalar_lea.sflag [#allocation3], %s187_s7 }
  0x14   : > { %s667_s23 = sshra.s32 %s198_s13, 4  ;;  %p671_p3 = pneg %p864_p13  ;;  %s668_s23 = int_to_ptr.hbm [resolvable:$true] %s667_s23 }
  0x15   : > { %s669_s25 = scalar_lea.hbm %s668_s23, 128  ;;  %s674_s28 = scalar_lea.hbm %s1046_s0, 256 }
  0x16   : > { %p670_p2 = scmp.ne.s32.totalorder %s668_s23, %s669_s25  ;;  %p675_p5 = scmp.lt.s32.totalorder %s668_s23, %s1046_s0 }
  0x17   : > { %p676_p8 = scmp.lt.s32.totalorder %s674_s28, %s669_s25 }
  0x18   : > { %p672_p4 = pnand %p671_p3, %p670_p2 }
  0x19   : > { %p677_p10 = por %p676_p8, %p675_p5 }
  0x1a   : > { %p673_p7 = pneg %p672_p4 }
  0x1c   : > { %p678_p9 = pnand %p677_p10, %p673_p7 }
  0x1e   : > { %681 = shalt.err (!%p678_p9)
}
  0x1f   : > { %s765_s7 = smov 256   ;;  %s766_s11 = smov 16  }
  0x20   : > { %611 = dma.hbm_to_vmem [thread:$0]  (!%p864_p13), %s198_s13, 2048, %s200_s15, %s188_s17, %s765_s7, %s765_s7, %s766_s11  }
  0x21   : > { %p208_p2 = pnand %p590_p0, %p207_p1 }
  0x22   : > { %s885_s12 = sand.u32 (!%p208_p2), 1, %s755_s19  }
  0x23   : > { %211 = sbr.rel (%p208_p2) target bundleno = 624 (0x270), region = 40  ;;  %s591_s14 = sshll.u32 (!%p208_p2), %s885_s12, 7 }
  0x24   : > { %s214_s23 = scalar_lea.sflag (!%p208_p2), [#allocation3], %s885_s12  ;;  %s217_s25 = scalar_lea.vmem (!%p208_p2), [#allocation2], %s591_s14 }
  0x28   : > { %742 = dma.done.wait (%p842_p6), %s214_s23, 2048  }
  0x29   : > { %744 = vsyncadd (%p842_p6), %s214_s23, 4294965248  ;;  %v895_v0 = vld [vmem:[%s217_s25] sm:$0xff]  ;;  %v897_v1 = vld [vmem:[%s217_s25 + $0x8] sm:$0xff]  ;;  %v310_v32 = vlaneseq  ;;  %vm315_vm0 = vcmask 130112   ;;  %vm319_vm1 = vcmask 195712   ;;  %vm323_vm2 = vcmask 261312  }
  0x2a   : > { %v899_v2 = vld [vmem:[%s217_s25 + $0x20] sm:$0xff]  ;;  %v261_v3 = vadd.f32 %v897_v1, %v895_v0  ;;  %v903_v4 = vld [vmem:[%s217_s25 + $0x28] sm:$0xff]  ;;  %v913_v9 = vld [vmem:[%s217_s25 + $0x10] sm:$0xff]  ;;  %vm327_vm3 = vcmask 326912   ;;  %vm331_vm4 = vcmask 392512   ;;  %vm335_vm5 = vcmask 458112  }
  0x2b   : > { %v905_v5 = vld [vmem:[%s217_s25 + $0x40] sm:$0xff]  ;;  %v907_v6 = vld [vmem:[%s217_s25 + $0x48] sm:$0xff]  ;;  %v267_v7 = vadd.f32 %v903_v4, %v899_v2  ;;  %v915_v10 = vld [vmem:[%s217_s25 + $0x18] sm:$0xff]  ;;  %v311_v36 = vand.u32 127, %v310_v32  ;;  %vm339_vm6 = vcmask 523712   ;;  %vm341_vm7 = vcmask 523264  }
  0x2c   : > { %v273_v8 = vadd.f32 %v907_v6, %v905_v5  ;;  %262 = vadd.xlane.f32.xlu0 %v261_v3  ;;  %v917_v11 = vld [vmem:[%s217_s25 + $0x30] sm:$0xff]  ;;  %v919_v12 = vld [vmem:[%s217_s25 + $0x38] sm:$0xff]  ;;  %v264_v15 = vadd.f32 %v915_v10, %v913_v9  ;;  %v931_v18 = vld [vmem:[%s217_s25 + $0x60] sm:$0xff]  ;;  %vm371_vm8 = vcmask 1043456   ;;  %vm367_vm9 = vcmask 31744   ;;  %s980_s9 = scalar_lea.vmem [#allocation5], %s591_s14 }
  0x2d   : > { %268 = vadd.xlane.f32.xlu1 %v267_v7  ;;  %v921_v13 = vld [vmem:[%s217_s25 + $0x50] sm:$0xff]  ;;  %v923_v14 = vld [vmem:[%s217_s25 + $0x58] sm:$0xff]  ;;  %v270_v16 = vadd.f32 %v919_v12, %v917_v11  ;;  %v933_v19 = vld [vmem:[%s217_s25 + $0x68] sm:$0xff]  ;;  %v313_v38 = vadd.s32 4294967288, %v311_v36  ;;  %v317_v39 = vadd.s32 4294967280, %v311_v36  ;;  %v321_v42 = vadd.s32 4294967272, %v311_v36 }
  0x2e   : > { %274 = vadd.xlane.f32.xlu2 %v273_v8  ;;  %v276_v17 = vadd.f32 %v923_v14, %v921_v13  ;;  %v935_v20 = vld [vmem:[%s217_s25 + $0x70] sm:$0xff]  ;;  %v937_v21 = vld [vmem:[%s217_s25 + $0x78] sm:$0xff]  ;;  %v279_v22 = vadd.f32 %v933_v19, %v931_v18  ;;  %v298_v26 = vld [vmem:[%s1047_s1 + $0x28] sm:$0xff]  ;;  %v325_v46 = vadd.s32 4294967264, %v311_v36  ;;  %v329_v53 = vadd.s32 4294967256, %v311_v36  ;;  %s603_s14 = sshll.u32 %s820_s22, 7 }
  0x2f   : > { %v282_v23 = vadd.f32 %v937_v21, %v935_v20  ;;  %v300_v24 = vld [vmem:[%s1047_s1 + $0x38] sm:$0xff]  ;;  %v299_v25 = vld [vmem:[%s1047_s1 + $0x30] sm:$0xff]  ;;  %v297_v27 = vld [vmem:[%s1047_s1 + $0x20] sm:$0xff]  ;;  %v333_v59 = vadd.s32 4294967248, %v311_v36  ;;  %v337_v62 = vadd.s32 4294967240, %v311_v36  ;;  %s507_s11 = scalar_lea.hbm %s1051_s5, %s603_s14  ;;  %s508_s23 = sshll.u32 %s980_s9, 4  ;;  %s509_s23 = int_to_ptr.vmem [resolvable:$true] %s508_s23 }
  0x30   : > { %352 = vmatpush.msra.mxu0 %v300_v24  ;;  %v296_v28 = vld [vmem:[%s1047_s1 + $0x18] sm:$0xff]  ;;  %v295_v29 = vld [vmem:[%s1047_s1 + $0x10] sm:$0xff]  ;;  %v294_v30 = vld [vmem:[%s1047_s1 + $0x8] sm:$0xff]  ;;  %s510_s25 = sshll.u32 %s507_s11, 4  ;;  %s496_s22 = scalar_lea.sflag [#allocation4], %s885_s12  ;;  %s511_s25 = int_to_ptr.hbm [resolvable:$true] %s510_s25 }
  0x31   : > { %v293_v31 = vld [vmem:[%s1047_s1] sm:$0xff]  ;;  %s711_s29 = sshra.s32 %s511_s25, 4  ;;  %s717_s17 = scalar_lea.hbm %s1051_s5, 256  ;;  %s712_s29 = int_to_ptr.hbm [resolvable:$true] %s711_s29 }
  0x32   : > { %353 = vmatpush.msra.mxu0 %v299_v25  ;;  %v365_v24 = vld [vmem:[%s1049_s3] sm:$0xf]  ;;  %s713_s13 = scalar_lea.hbm %s712_s29, 128  ;;  %p718_p0 = scmp.lt.s32.totalorder %s712_s29, %s1051_s5 }
  0x33   : > { %594 = vmatpush.msk.msra.mxu1 %vm371_vm8, %v365_v24  ;;  %v301_v25 = vld [vmem:[%s1048_s2] sm:$0x1]  ;;  %p714_p6 = scmp.ne.s32.totalorder %s712_s29, %s713_s13  ;;  %p719_p1 = scmp.lt.s32.totalorder %s717_s17, %s713_s13 }
  0x34   : > { %265 = vadd.xlane.f32.xlu0 %v264_v15  ;;  %354 = vmatpush.msra.mxu0 %v298_v26 }
  0x35   : > { %271 = vadd.xlane.f32.xlu1 %v270_v16  ;;  %p715_p9 = pnand %p714_p6, %p849_p11  ;;  %p720_p3 = por %p719_p1, %p718_p0 }
  0x36   : > { %277 = vadd.xlane.f32.xlu2 %v276_v17  ;;  %355 = vmatpush.msra.mxu0 %v297_v27 }
  0x37   : > { %p716_p13 = pneg %p715_p9 }
  0x38   : > { %356 = vmatpush.msra.mxu0 %v296_v28 }
  0x39   : > { %p721_p4 = pnand %p720_p3, %p716_p13 }
  0x3a   : > { %357 = vmatpush.msra.mxu0 %v295_v29  ;;  %v416_v29 = vshrl.u32 %v310_v32, 7 }
  0x3c   : > { %280 = vadd.xlane.f32.xlu0 %v279_v22  ;;  %358 = vmatpush.msra.mxu0 %v294_v30  ;;  %v429_v30 = vadd.s32 16, %v416_v29 }
  0x3d   : > { %283 = vadd.xlane.f32.xlu1 %v282_v23  ;;  %654 = vset.pattern.permute.xlu2 %v416_v29 }
  0x3e   : > { %359 = vmatpush.msra.mxu0 %v293_v31  ;;  %v423_v31 = vadd.s32 8, %v416_v29  ;;  %656 = vset.pattern.permute.xlu1 %v429_v30 }
  0x40   : > { %655 = vset.pattern.permute.xlu0 %v423_v31 }
  0x9f   : > { %v263_v33 = vpop.xlane.xlu0 %262 }
  0xa0   : > { %v269_v34 = vpop.xlane.xlu1 %268  ;;  %v285_v37 = vmul.f32 0.00390625, %v263_v33  ;;  %v366_v33 = vld [vmem:[%s1050_s4] sm:$0x1] }
  0xa1   : > { %v275_v35 = vpop.xlane.xlu2 %274  ;;  %v287_v40 = vmul.f32 0.00390625, %v269_v34 }
  0xa2   : > { %v312_v48 = vperm.slane %v285_v37, %v311_v36  ;;  %v289_v49 = vmul.f32 0.00390625, %v275_v35 }
  0xa3   : > { %v318_v51 = vperm.slane %v287_v40, %v317_v39 }
  0xa4   : > { %v326_v57 = vperm.slane %v289_v49, %v325_v46  ;;  %v447_v49 = vadd.s32 40, %v416_v29 }
  0xa7   : > { %v266_v41 = vpop.xlane.xlu0 %265 }
  0xa8   : > { %v286_v43 = vmul.f32 0.00390625, %v266_v41  ;;  %v272_v44 = vpop.xlane.xlu1 %271 }
  0xa9   : > { %v278_v45 = vpop.xlane.xlu2 %277  ;;  %v288_v47 = vmul.f32 0.00390625, %v272_v44 }
  0xaa   : > { %v314_v50 = vperm.slane %v286_v43, %v313_v38  ;;  %v290_v54 = vmul.f32 0.00390625, %v278_v45 }
  0xab   : > { %v322_v52 = vperm.slane %v288_v47, %v321_v42 }
  0xac   : > { %v316_v55 = vsel %vm315_vm0, %v314_v50, %v312_v48  ;;  %v330_v60 = vperm.slane %v290_v54, %v329_v53  ;;  %v435_v50 = vadd.s32 24, %v416_v29  ;;  %v453_v53 = vadd.s32 48, %v416_v29 }
  0xad   : > { %v320_v56 = vsel %vm319_vm1, %v318_v51, %v316_v55  ;;  %v459_v51 = vadd.s32 56, %v416_v29 }
  0xae   : > { %v324_v58 = vsel %vm323_vm2, %v322_v52, %v320_v56  ;;  %v441_v52 = vadd.s32 32, %v416_v29 }
  0xaf   : > { %v281_v61 = vpop.xlane.xlu0 %280  ;;  %v328_v7 = vsel %vm327_vm3, %v326_v57, %v324_v58 }
  0xb0   : > { %v291_v63 = vmul.f32 0.00390625, %v281_v61  ;;  %v284_v3 = vpop.xlane.xlu1 %283  ;;  %v332_v17 = vsel %vm331_vm4, %v330_v60, %v328_v7 }
  0xb1   : > { %v292_v8 = vmul.f32 0.00390625, %v284_v3 }
  0xb2   : > { %v334_v15 = vperm.slane %v291_v63, %v333_v59 }
  0xb3   : > { %v338_v16 = vperm.slane %v292_v8, %v337_v62 }
  0xb4   : > { %v336_v22 = vsel %vm335_vm5, %v334_v15, %v332_v17 }
  0xb5   : > { %v340_v23 = vsel %vm339_vm6, %v338_v16, %v336_v22 }
  0xb6   : > { %593 = vmatmul.msk.f32.vlgmr.msra.gmra.mxu0 %vm341_vm7, %v340_v23 }
 0x133   : > { %v361_v26 = vpop.f32.mrf.mxu0 }
 0x134   : > { %v362_v27 = vadd.f32 %v361_v26, %v301_v25 }
 0x136   : > { %v364_v28 = vmax.f32 %v362_v27, 0.0 }
 0x138   : > { %595 = vmatmul.msk.f32.vlgmr.msra.gmra.mxu1 %vm367_vm9, %v364_v28 }
 0x1b5   : > { %v392_v34 = vpop.f32.mrf.mxu1 }
 0x1b6   : > { %v393_v35 = vadd.f32 %v392_v34, %v366_v33 }
 0x1b8   : > { %v596_v36 = vmul.f32 -1.442695, %v393_v35 }
 0x1ba   : > { %663 = vpow2.f32 %v596_v36 }
 0x1c0   : > { %v664_v37 = vpop.eup %663 }
 0x1c1   : > { %v398_v38 = vadd.f32 1.0, %v664_v37 }
 0x1c3   : > { %665 = vrcp.f32 %v398_v38  ;;  %v410_v32 = vand.u32 2147483648, %v398_v38  ;;  %v408_v43 = vand.u32 2147483647, %v398_v38  ;;  %vm404_vm11 = vweird.f32 %v398_v38 }
 0x1c5   : > { %v411_v45 = vor.u32 1.1754944e-38, %v410_v32  ;;  %vm409_vm13 = vcmp.eq.f32.partialorder %v408_v43, 8.507059e+37 }
 0x1c9   : > { %v666_v39 = vpop.eup %665 }
 0x1ca   : > { %v400_v40 = vmul.f32 %v666_v39, %v398_v38  ;;  %vm405_vm10 = vweird.f32 %v666_v39 }
 0x1cb   : > { %vm406_vm12 = vmor %vm404_vm11, %vm405_vm10 }
 0x1cc   : > { %v401_v41 = vsub.f32 1.0, %v400_v40 }
 0x1ce   : > { %v402_v42 = vmul.f32 %v666_v39, %v401_v41 }
 0x1d0   : > { %v403_v44 = vadd.f32 %v666_v39, %v402_v42 }
 0x1d2   : > { %v407_v46 = vsel %vm406_vm12, %v666_v39, %v403_v44 }
 0x1d3   : > { %v412_v47 = vsel %vm409_vm13, %v411_v45, %v407_v46 }
 0x1d4   : > { %v414_v48 = vperm.slane %v412_v47, 0 }
 0x1d6   : > { %431 = vperm.xlu1 %656, %v414_v48   ;;  %425 = vperm.xlu0 %655, %v414_v48  }
 0x1d7   : > { %419 = vperm.xlu2 %654, %v414_v48  }
 0x1de   : > { %659 = vset.pattern.permute.xlu1 %v447_v49  ;;  %662 = vset.pattern.permute.xlu0 %v459_v51 }
 0x1df   : > { %657 = vset.pattern.permute.xlu2 %v435_v50 }
 0x1e6   : > { %449 = vperm.xlu1 %659, %v414_v48  }
 0x1e7   : > { %437 = vperm.xlu2 %657, %v414_v48  }
 0x1ee   : > { %661 = vset.pattern.permute.xlu1 %v459_v51 }
 0x1ef   : > { %658 = vset.pattern.permute.xlu2 %v441_v52 }
 0x1f6   : > { %461 = vperm.xlu1 %661, %v414_v48  }
 0x1f7   : > { %443 = vperm.xlu2 %658, %v414_v48  }
 0x1ff   : > { %660 = vset.pattern.permute.xlu2 %v453_v53 }
 0x207   : > { %455 = vperm.xlu2 %660, %v414_v48  }
 0x231   : > { %v420_v54 = vpop.permute.xlu2 %419 }
 0x232   : > { %v463_v55 = vmul.f32 %v420_v54, %v895_v0  ;;  %v464_v56 = vmul.f32 %v420_v54, %v897_v1 }
 0x234   : > { %479 = vst [vmem:[%s980_s9] sm:$0xff] %v463_v55 }
 0x235   : > { %480 = vst [vmem:[%s980_s9 + $0x8] sm:$0xff] %v464_v56 }
 0x241   : > { %v438_v57 = vpop.permute.xlu2 %437 }
 0x242   : > { %v469_v58 = vmul.f32 %v438_v57, %v917_v11  ;;  %v470_v0 = vmul.f32 %v438_v57, %v919_v12 }
 0x244   : > { %485 = vst [vmem:[%s980_s9 + $0x30] sm:$0xff] %v469_v58 }
 0x245   : > { %486 = vst [vmem:[%s980_s9 + $0x38] sm:$0xff] %v470_v0 }
 0x248   : > { %v432_v1 = vpop.permute.xlu1 %431  ;;  %v426_v59 = vpop.permute.xlu0 %425 }
 0x249   : > { %v467_v60 = vmul.f32 %v432_v1, %v899_v2  ;;  %v468_v61 = vmul.f32 %v432_v1, %v903_v4  ;;  %v465_v62 = vmul.f32 %v426_v59, %v913_v9  ;;  %v466_v63 = vmul.f32 %v426_v59, %v915_v10 }
 0x24b   : > { %483 = vst [vmem:[%s980_s9 + $0x20] sm:$0xff] %v467_v60 }
 0x24c   : > { %484 = vst [vmem:[%s980_s9 + $0x28] sm:$0xff] %v468_v61 }
 0x24d   : > { %481 = vst [vmem:[%s980_s9 + $0x10] sm:$0xff] %v465_v62 }
 0x24e   : > { %482 = vst [vmem:[%s980_s9 + $0x18] sm:$0xff] %v466_v63 }
 0x251   : > { %v444_v11 = vpop.permute.xlu2 %443 }
 0x252   : > { %v471_v12 = vmul.f32 %v444_v11, %v905_v5  ;;  %v472_v2 = vmul.f32 %v444_v11, %v907_v6 }
 0x254   : > { %487 = vst [vmem:[%s980_s9 + $0x40] sm:$0xff] %v471_v12 }
 0x255   : > { %488 = vst [vmem:[%s980_s9 + $0x48] sm:$0xff] %v472_v2 }
 0x258   : > { %v450_v4 = vpop.permute.xlu1 %449 }
 0x259   : > { %v473_v9 = vmul.f32 %v450_v4, %v921_v13  ;;  %v474_v3 = vmul.f32 %v450_v4, %v923_v14 }
 0x25b   : > { %489 = vst [vmem:[%s980_s9 + $0x50] sm:$0xff] %v473_v9 }
 0x25c   : > { %490 = vst [vmem:[%s980_s9 + $0x58] sm:$0xff] %v474_v3 }
 0x261   : > { %v456_v10 = vpop.permute.xlu2 %455 }
 0x262   : > { %v475_v7 = vmul.f32 %v456_v10, %v931_v18  ;;  %v476_v5 = vmul.f32 %v456_v10, %v933_v19 }
 0x264   : > { %491 = vst [vmem:[%s980_s9 + $0x60] sm:$0xff] %v475_v7 }
 0x265   : > { %492 = vst [vmem:[%s980_s9 + $0x68] sm:$0xff] %v476_v5 }
 0x268   : > { %v462_v6 = vpop.permute.xlu1 %461 }
 0x269   : > { %v477_v13 = vmul.f32 %v462_v6, %v935_v20  ;;  %v478_v14 = vmul.f32 %v462_v6, %v937_v21 }
 0x26b   : > { %493 = vst [vmem:[%s980_s9 + $0x70] sm:$0xff] %v477_v13 }
 0x26c   : > { %494 = vst [vmem:[%s980_s9 + $0x78] sm:$0xff] %v478_v14 }
 0x26d   : > { %724 = shalt.err (!%p721_p4)
}
 0x26e   : > { %s767_s12 = smov 256   ;;  %s768_s28 = smov 16  }
 0x26f   : > { %606 = dma.vmem_to_hbm [thread:$0]  (%p849_p11), %s509_s23, 2048, %s511_s25, %s496_s22, %s767_s12, %s767_s12, %s768_s28  }
 0x270 PF: > { %s525_s9 = sand.u32 1, %s751_s18   ;;  %p1057_p7 = scmp.ge.s32.totalorder %s763_s21, 2 }
 0x271   : > { %s526_s14 = scalar_lea.sflag [#allocation4], %s525_s9 }
 0x272   : > { %p613_p5 = pnand %p1057_p7, %p853_p12 }
 0x274   : > { %p614_p8 = pneg %p613_p5 }
 0x276   : > { %746 = dma.done.wait (%p614_p8), %s526_s14, 2048  }
 0x277   : > { %748 = vsyncadd (%p614_p8), %s526_s14, 4294965248  ;;  %p18_p10 = scmp.ge.s32.totalorder %s824_s24, 4   ;;  %s1058_s18 = smov %s755_s19 }
 0x278   : > { %s1059_s19 = smov %s759_s20  ;;  %s1060_s20 = smov %s836_s27 }
 0x279   : > { %s1061_s21 = smov %s824_s24  ;;  %20 = sbr.rel (!%p18_p10) target bundleno = 5 (0x5), region = 85 }
 0x27e   :  { %532 = vsyncpa [#allocation3], 1 }
 0x27f   :  { %534 = vsyncpa [#allocation3 + $0x1], 1 }
 0x280   :  { %535 = vsyncpa [#allocation4], 1 }
 0x281   :  { %537 = vsyncpa [#allocation4 + $0x1], 1 }

</bundles_post_ra>
